<compile_context>
chip_gen: v7x
topology: tpu7x:2x2x1
jax: 0.10.0
libtpu: 0.0.40
codegen_flags: <defaults>
</compile_context>

<pallas_src>
import math

import jax
import jax.numpy as jnp
from jax import lax
from jax.experimental import pallas as pl
from jax.experimental.pallas import tpu as pltpu


# ----------------------------------------------------------------------------
# Interpolation matrices
# ----------------------------------------------------------------------------

def _interp_matrix(Lf: int, Lw: int, dtype=jnp.float32):
    """Dense reference matrix M (Lf, Lw) s.t. out = amps @ M reproduces
    F.interpolate(amps, Lw, mode='linear', align_corners=False).  Used only by
    the pure-JAX reference."""
    scale = Lf / Lw
    j = jnp.arange(Lw, dtype=jnp.float32)
    src = (j + 0.5) * scale - 0.5
    src = jnp.maximum(src, 0.0)
    i0 = jnp.floor(src).astype(jnp.int32)
    i0 = jnp.minimum(i0, Lf - 1)
    i1 = jnp.minimum(i0 + 1, Lf - 1)
    w1 = src - i0.astype(jnp.float32)
    w0 = 1.0 - w1
    cols = jnp.arange(Lw)
    M = jnp.zeros((Lf, Lw), jnp.float32)
    M = M.at[i0, cols].add(w0)
    M = M.at[i1, cols].add(w1)
    return M.astype(dtype)


def _local_interp_matrix(G: int, S: int, dtype=jnp.float32):
    """Tile-invariant banded interpolation matrix (G+2, G*S).

    Row r corresponds to frame (tile_start - 1 + r) of the edge-replicated
    amps sequence; column t is output sample t within the tile.  Valid only
    for integer upsampling (Lw == Lf*S), which is what this module does."""
    t = jnp.arange(G * S, dtype=jnp.float32)
    src = (t + 0.5) / S - 0.5 + 1.0          # padded-row coordinate, in (0, G+1)
    i0 = jnp.floor(src).astype(jnp.int32)    # in [0, G]
    i1 = i0 + 1                              # in [1, G+1]
    w1 = src - i0.astype(jnp.float32)
    w0 = 1.0 - w1
    cols = jnp.arange(G * S)
    M = jnp.zeros((G + 2, G * S), jnp.float32)
    M = M.at[i0, cols].add(w0)
    M = M.at[i1, cols].add(w1)
    return M.astype(dtype)


# ----------------------------------------------------------------------------
# Tiling heuristics
# ----------------------------------------------------------------------------

def _round_up(v: int, m: int) -> int:
    return (v + m - 1) // m * m


def _choose_num_segments(Lf: int, S: int, max_lanes: int = 1024) -> int:
    """Pick G (frames per Lw tile), G | Lf, preferring a lane-aligned tile
    (G*S % 128 == 0) no wider than max_lanes.  Never falls back to the full
    dense width (that would materialise an (Lf+2, Lf*S) matrix in VMEM)."""
    divisors = [g for g in range(1, Lf + 1) if Lf % g == 0]
    fit = [g for g in divisors if g * S <= max_lanes]
    aligned = [g for g in fit if (g * S) % 128 == 0]
    if aligned:
        return max(aligned)
    if fit:                       # unaligned tail -> masked stores, still cheap
        return max(fit)
    return 1                      # minimum granularity (tile width == S)


def _choose_batch_block(N: int, Nh: int, tLw: int, nT: int,
                        target_bytes: int) -> int:
    """Largest divisor Bn of N whose output block (Bn*Nh*tLw*4 B) fits the
    target, reduced if needed so the grid has >= 2 steps (megacore balance)."""
    divisors = [b for b in range(1, N + 1) if N % b == 0]
    per_batch = Nh * tLw * 4
    ok = [b for b in divisors if b * per_batch <= target_bytes]
    Bn = max(ok) if ok else 1
    while Bn > 1 and (N // Bn) * nT < 2:
        Bn = max(b for b in divisors if b < Bn)
    return Bn


def _vmem_limit_bytes(Bn: int, Nh: int, C: int, G: int, tLw: int) -> int:
    """Estimate per-step VMEM (double-buffered blocks + scratch, with lane /
    sublane padding) and return a limit with headroom, capped at v7x's 64 MiB."""
    f = 4
    xw_blk = Bn * _round_up(G + 2, 8) * _round_up(C, 128) * f
    w_blk = _round_up(Nh, 8) * _round_up(C, 128) * f
    b_blk = _round_up(Nh, 8) * 128 * f
    mloc_blk = _round_up(G + 2, 8) * _round_up(tLw, 128) * f
    out_blk = _round_up(Bn * Nh, 8) * _round_up(tLw, 128) * f
    scratch = _round_up(Bn * Nh, 8) * _round_up(G + 2, 128) * f
    used = 2 * (xw_blk + w_blk + b_blk + mloc_blk + out_blk) + scratch
    return int(min(max(2 * used + (4 << 20), 32 << 20), 64 << 20))


# ----------------------------------------------------------------------------
# Kernel
# ----------------------------------------------------------------------------

def _kernel(xw_ref, w_ref, b_ref, mloc_ref, out_ref, amps_ref):
    # xw_ref:   (Bn, G+2, C)    x window, C on the lane axis (dense for C>=128)
    # w_ref:    (Nh, C)         1x1 conv weight
    # b_ref:    (Nh, 1)         conv bias (kept in-kernel; hidden under slack)
    # mloc_ref: (G+2, tLw)      tile-invariant banded interpolation matrix
    # out_ref:  (Bn*Nh, tLw)    lane-dense output block
    # amps_ref: (Bn*Nh, G+2)    f32 scratch for conv results
    Bn = xw_ref.shape[0]
    Nh = w_ref.shape[0]
    # 1x1 conv per batch in the block: (Nh, C) x (G+2, C)^T -> (Nh, G+2).
    # Static unroll: Bn is small; rows b*Nh are sublane-aligned when Nh % 8 == 0.
    for bi in range(Bn):
        a = lax.dot_general(w_ref[...], xw_ref[bi],
                            (((1,), (1,)), ((), ())),
                            preferred_element_type=jnp.float32)        # (Nh, G+2)
        amps_ref[pl.ds(bi * Nh, Nh), :] = a + b_ref[...]
    # Banded linear interpolation: one MXU matmul over all batches at once.
    out_ref[...] = jnp.dot(amps_ref[...], mloc_ref[...],
                           preferred_element_type=jnp.float32).astype(out_ref.dtype)


# ----------------------------------------------------------------------------
# Wrapper
# ----------------------------------------------------------------------------

def harmonic_oscillator_onnx_wrapper(x, weight, bias, segment_size, *,
                                     max_tile_lanes: int = 1024,
                                     target_block_bytes: int = int(1.5 * (1 << 20))):
    """x: (N, C, Lf) float32.  weight: (Nh, C, 1).  bias: (Nh,).
    Returns F.interpolate(Conv1d_1x1(x), Lf*segment_size, mode='linear')
    of shape (N, Nh, Lw) with Lw = Lf * segment_size."""
    N, C, Lf = x.shape
    Nh = weight.shape[0]
    S = int(segment_size)
    Lw = Lf * S

    G = _choose_num_segments(Lf, S, max_tile_lanes)     # frames per Lw tile
    nT = Lf // G
    tLw = G * S
    Bn = _choose_batch_block(N, Nh, tLw, nT, target_block_bytes)
    nB = N // Bn

    x = x.astype(jnp.float32)
    w2d = weight.reshape(Nh, C).astype(jnp.float32)
    b2d = bias.reshape(Nh, 1).astype(jnp.float32)
    mloc = _local_interp_matrix(G, S)                   # (G+2, tLw), 2 nnz/col

    # Edge-replicate one frame per side and pre-window x, with C on the LANE
    # axis so the kernel-side x stream is lane-dense.  Layout plumbing in XLA;
    # x is ~C/(Nh*S) of the output bytes, so the (G+2)/G duplication is noise.
    x_pad = jnp.pad(x, ((0, 0), (0, 0), (1, 1)), mode="edge")          # (N, C, Lf+2)
    win = jnp.arange(nT)[:, None] * G + jnp.arange(G + 2)[None, :]     # (nT, G+2)
    xw = jnp.transpose(x_pad[:, :, win], (2, 0, 3, 1))                 # (nT, N, G+2, C)

    flops = 2 * N * nT * Nh * (G + 2) * (C + tLw)
    bytes_accessed = 4 * (xw.size + w2d.size + b2d.size + mloc.size + N * Nh * Lw)

    out_flat = pl.pallas_call(
        _kernel,
        out_shape=jax.ShapeDtypeStruct((N * Nh, Lw), jnp.float32),
        grid_spec=pltpu.PrefetchScalarGridSpec(
            num_scalar_prefetch=0,
            grid=(nB, nT),
            in_specs=[
                # per-(batch-block, tile) window of x; kernel sees (Bn, G+2, C)
                pl.BlockSpec((pl.Squeezed(), Bn, G + 2, C),
                             lambda nb, l: (l, nb, 0, 0)),
                # grid-invariant operands (tiny; re-fetch skipped by Pallas)
                pl.BlockSpec((Nh, C), lambda nb, l: (0, 0)),
                pl.BlockSpec((Nh, 1), lambda nb, l: (0, 0)),
                pl.BlockSpec((G + 2, tLw), lambda nb, l: (0, 0)),
            ],
            out_specs=pl.BlockSpec((Bn * Nh, tLw), lambda nb, l: (nb, l)),
            scratch_shapes=[pltpu.VMEM((Bn * Nh, G + 2), jnp.float32)],
        ),
        compiler_params=pltpu.CompilerParams(
            dimension_semantics=("parallel", "parallel"),
            vmem_limit_bytes=_vmem_limit_bytes(Bn, Nh, C, G, tLw)),
        cost_estimate=pl.CostEstimate(flops=int(flops), transcendentals=0,
                                      bytes_accessed=int(bytes_accessed)),
    )(xw, w2d, b2d, mloc)

    return out_flat.reshape(N, Nh, Lw)


# ----------------------------------------------------------------------------
# Pure-JAX reference (PyTorch semantics) and test
# ----------------------------------------------------------------------------

def _reference(x, weight, bias, segment_size):
    N, C, Lf = x.shape
    Nh = weight.shape[0]
    Lw = Lf * segment_size
    amps = jnp.einsum("hc,ncl->nhl", weight.reshape(Nh, C), x) + bias[None, :, None]
    M = _interp_matrix(Lf, Lw)
    return jnp.einsum("nhl,lw->nhw", amps, M)


if __name__ == "__main__":
    # Small shapes consistent with the module (scaled-down channels / harmonics).
    N, C, Nh, Lf = 2, 32, 16, 8
    segment_size = 16                      # Lw = 128

    key = jax.random.PRNGKey(0)
    kx, kw, kb = jax.random.split(key, 3)
    x = jax.random.normal(kx, (N, C, Lf), dtype=jnp.float32)
    # Deterministic Conv1d(C, Nh, 1) parameters.
    weight = jax.random.normal(kw, (Nh, C, 1), dtype=jnp.float32) * (1.0 / math.sqrt(C))
    bias = jax.random.normal(kb, (Nh,), dtype=jnp.float32) * 0.1

    out = harmonic_oscillator_onnx_wrapper(x, weight, bias, segment_size)
    out = jax.block_until_ready(out)

    ref = _reference(x, weight, bias, segment_size)
    assert out.shape == (N, Nh, Lf * segment_size)
    assert jnp.allclose(out, ref, atol=1e-4, rtol=1e-4)

    print("KERNEL_OK")
</pallas_src>

<mosaic_0001>
module attributes {stable_mosaic.version = 11 : i64} {
  func.func @_kernel(%arg0: i32, %arg1: i32, %arg2: memref<1x1x10x32xf32, #tpu.memory_space<vmem>>, %arg3: memref<16x32xf32, #tpu.memory_space<vmem>>, %arg4: memref<16x1xf32, #tpu.memory_space<vmem>>, %arg5: memref<10x128xf32, #tpu.memory_space<vmem>>, %arg6: memref<16x128xf32, #tpu.memory_space<vmem>>, %arg7: memref<16x10xf32, #tpu.memory_space<vmem>>) attributes {dimension_semantics = [#tpu.dimension_semantics<parallel>, #tpu.dimension_semantics<parallel>], iteration_bounds = array<i64: 2, 1>, scalar_prefetch = 0 : i64, scratch_operands = 1 : i64, tpu.core_type = #tpu.core_type<tc>, window_params = [{transform_indices = @transform_0, window_bounds = array<i64: 1, 1, 10, 32>}, {pipeline_mode = #tpu.pipeline_mode<synchronous>, transform_indices = @transform_1, window_bounds = array<i64: 16, 32>}, {pipeline_mode = #tpu.pipeline_mode<synchronous>, transform_indices = @transform_2, window_bounds = array<i64: 16, 1>}, {pipeline_mode = #tpu.pipeline_mode<synchronous>, transform_indices = @transform_3, window_bounds = array<i64: 10, 128>}, {transform_indices = @transform_4, window_bounds = array<i64: 16, 128>}]} {
    %c0 = arith.constant 0 : index
    %c0_0 = arith.constant 0 : index
    %0 = vector.load %arg3[%c0, %c0_0] : memref<16x32xf32, #tpu.memory_space<vmem>>, vector<16x32xf32>
    %c0_1 = arith.constant 0 : index
    %c0_2 = arith.constant 0 : index
    %c0_3 = arith.constant 0 : index
    %c0_4 = arith.constant 0 : index
    %1 = vector.load %arg2[%c0_1, %c0_2, %c0_3, %c0_4] : memref<1x1x10x32xf32, #tpu.memory_space<vmem>>, vector<1x1x10x32xf32>
    %2 = vector.shape_cast %1 : vector<1x1x10x32xf32> to vector<10x32xf32>
    %cst = arith.constant dense<0.000000e+00> : vector<16x10xf32>
    %3 = tpu.matmul %0, %2, %cst {dimension_numbers = #tpu.dot_dimension_numbers<[1], [1], [0], [0], [0, 0, 1, 0], [], []>} : vector<16x32xf32>, vector<10x32xf32>, vector<16x10xf32> -> vector<16x10xf32>
    %c0_5 = arith.constant 0 : index
    %c0_6 = arith.constant 0 : index
    %4 = vector.load %arg4[%c0_5, %c0_6] : memref<16x1xf32, #tpu.memory_space<vmem>>, vector<16x1xf32>
    %5 = vector.broadcast %4 : vector<16x1xf32> to vector<16x10xf32>
    %6 = arith.addf %3, %5 : vector<16x10xf32>
    %c0_7 = arith.constant 0 : index
    %c0_8 = arith.constant 0 : index
    %7 = vector.load %arg7[%c0_7, %c0_8] : memref<16x10xf32, #tpu.memory_space<vmem>>, vector<16x10xf32>
    tpu.vector_store %arg7[%c0_7, %c0_8], %6 {strides = array<i32>} : memref<16x10xf32, #tpu.memory_space<vmem>>, vector<16x10xf32>,
    %c0_9 = arith.constant 0 : index
    %c0_10 = arith.constant 0 : index
    %8 = vector.load %arg7[%c0_9, %c0_10] : memref<16x10xf32, #tpu.memory_space<vmem>>, vector<16x10xf32>
    %c0_11 = arith.constant 0 : index
    %c0_12 = arith.constant 0 : index
    %9 = vector.load %arg5[%c0_11, %c0_12] : memref<10x128xf32, #tpu.memory_space<vmem>>, vector<10x128xf32>
    %cst_13 = arith.constant dense<0.000000e+00> : vector<16x128xf32>
    %10 = tpu.matmul %8, %9, %cst_13 {dimension_numbers = #tpu.dot_dimension_numbers<[1], [0], [0], [1], [0, 0, 1, 1], [], []>} : vector<16x10xf32>, vector<10x128xf32>, vector<16x128xf32> -> vector<16x128xf32>
    %c0_14 = arith.constant 0 : index
    %c0_15 = arith.constant 0 : index
    %11 = vector.load %arg6[%c0_14, %c0_15] : memref<16x128xf32, #tpu.memory_space<vmem>>, vector<16x128xf32>
    tpu.vector_store %arg6[%c0_14, %c0_15], %10 {strides = array<i32>} : memref<16x128xf32, #tpu.memory_space<vmem>>, vector<16x128xf32>,
    return
  }
  func.func @transform_0(%arg0: i32, %arg1: i32) -> (i32, i32, i32, i32) {
    %c0_i32 = arith.constant 0 : i32
    %c0_i32_0 = arith.constant 0 : i32
    %c0_i32_1 = arith.constant 0 : i32
    return %arg1, %arg0, %c0_i32, %c0_i32_0 : i32, i32, i32, i32
  }
  func.func @transform_1(%arg0: i32, %arg1: i32) -> (i32, i32) {
    %c0_i32 = arith.constant 0 : i32
    %c0_i32_0 = arith.constant 0 : i32
    %c0_i32_1 = arith.constant 0 : i32
    return %c0_i32, %c0_i32_0 : i32, i32
  }
  func.func @transform_2(%arg0: i32, %arg1: i32) -> (i32, i32) {
    %c0_i32 = arith.constant 0 : i32
    %c0_i32_0 = arith.constant 0 : i32
    %c0_i32_1 = arith.constant 0 : i32
    return %c0_i32, %c0_i32_0 : i32, i32
  }
  func.func @transform_3(%arg0: i32, %arg1: i32) -> (i32, i32) {
    %c0_i32 = arith.constant 0 : i32
    %c0_i32_0 = arith.constant 0 : i32
    %c0_i32_1 = arith.constant 0 : i32
    return %c0_i32, %c0_i32_0 : i32, i32
  }
  func.func @transform_4(%arg0: i32, %arg1: i32) -> (i32, i32) {
    %c0_i32 = arith.constant 0 : i32
    return %arg0, %arg1 : i32, i32
  }
}

</mosaic_0001>

<bundles_post_ra>
// kernel: tpu_custom_call.1
= control target key start
LH: loop header
LB: loop body
LE: loop exit
PB: predicated region body
PF: predicated region fallthrough
CT: control target
= control target key end

     0   :  { %9 = vsyncpa [#allocation4], 0  ;;  %s882_s0 = inlined_call_operand.vmem [shape: f32[1,2,10,32], index: 0, kind: input, shape index: {}]   ;;  %s883_s1 = inlined_call_operand.vmem [shape: f32[16,32], index: 1, kind: input, shape index: {}]   ;;  %s884_s2 = inlined_call_operand.vmem [shape: f32[16,1], index: 2, kind: input, shape index: {}]   ;;  %s885_s3 = inlined_call_operand.vmem [shape: f32[10,128], index: 3, kind: input, shape index: {}]   ;;  %s886_s4 = inlined_call_operand.hbm [shape: f32[32,128], index: 4, kind: output, shape index: {}]  }
   0x1   :  { %11 = vsyncpa [#allocation4 + $0x1], 0  ;;  %s745_s15 = smov 0   ;;  %s747_s16 = smov 0  }
   0x2   :  { %s749_s17 = smov 0   ;;  %s751_s18 = smov 0  }
   0x3   :  { %s753_s19 = smov 0   ;;  %s755_s20 = smov 0  }
   0x4 LB: > { %s519_s21 = sadd.s32 4294967295, %s713_s20   ;;  %s520_s22 = sadd.s32 4294967294, %s713_s20   ;;  %s713_s20 = sphi %s755_s20, %s17_s20   ;;  %s709_s19 = sphi %s753_s19, %s893_s19   ;;  %s705_s18 = sphi %s751_s18, %s892_s18   ;;  %s701_s17 = sphi %s749_s17, %s891_s17   ;;  %s697_s16 = sphi %s747_s16, %s890_s16   ;;  %s693_s15 = sphi %s745_s15, %s889_s15  }
   0x5   : > { %s29_s23 = sadd.s32 1, %s709_s19  ;;  %s129_s24 = sadd.s32 1, %s701_s17 }
   0x6   : > { %p31_p0 = scmp.ge.s32.totalorder %s29_s23, 2  ;;  %p139_p1 = scmp.ne.s32.totalorder %s701_s17, %s697_s16 }
   0x7   : > { %p140_p2 = scmp.eq.s32.totalorder %s519_s21, 1  ;;  %p145_p3 = scmp.ne.s32.totalorder %s697_s16, %s693_s15 }
   0x8   : > { %s895_s23 = smov (%p31_p0, %s29_s23), 0  ;;  %p146_p5 = scmp.eq.s32.totalorder %s520_s22, 1 }
   0x9   : > { %p785_p4 = por %p140_p2, %p139_p1  ;;  %s124_s26 = ssub.s32 %s709_s19, %s895_s23 }
   0xa   : > { %p523_p6 = scmp.ge.s32.totalorder %s713_s20, 1  ;;  %p127_p7 = scmp.eq.s32.totalorder %s124_s26, 0 }
   0xb   : > { %p792_p8 = por %p146_p5, %p145_p3  ;;  %p185_p9 = scmp.lt.s32.totalorder %s713_s20, 3 }
   0xc   : > { %s798_s28 = scalar_select %p127_p7, %s701_s17, %s129_s24  }
   0xd   : > { %p186_p10 = pnand %p523_p6, %p185_p9 }
   0xe   : > { %p217_p11 = scmp.lt.s32.totalorder (!%p186_p10), %s705_s18, 1  ;;  %vm241_vm0 = vcmask (!%p186_p10), 261120   ;;  %v225_v0 = vld [vmem:[%s883_s1] sm:$0xff] (!%p186_p10)  ;;  %v715_v2 = vmov (!%p186_p10), 0   ;;  %v230_v3 = vld [vmem:[%s884_s2 + $0x8] sm:$0xff] (!%p186_p10)  ;;  %vm342_vm2 = vcmask (!%p186_p10), 1041408  }
   0xf   : > { %189 = sbr.rel (%p186_p10) target bundleno = 489 (0x1e9), region = 36  ;;  %v229_v1 = vld [vmem:[%s884_s2] sm:$0xff] (!%p186_p10)  ;;  %553 = vmatprep.mubr.msk.f32.mxu0 (!%p186_p10), %vm241_vm0, %v225_v0  ;;  %634 = vset.pattern.permute.xlu0 (!%p186_p10), %v715_v2  ;;  %vm564_vm1 = vmpackc.low (!%p186_p10), %vm241_vm0, %vm241_vm0  ;;  %v226_v7 = vld [vmem:[%s883_s1 + $0x8] sm:$0xff] (!%p186_p10)  ;;  %vm716_vm3 = vmmov (!%p186_p10), 1   ;;  %vm329_vm5 = vcmask (!%p186_p10), 80896   ;;  %s212_s30 = sand.u32 (!%p186_p10), 1, %s697_s16  }
  0x10   : > { %233 = vperm.xlu0 (!%p186_p10), %634, %v229_v1   ;;  %v334_v8 = vld [vmem:[%s885_s3] sm:$0xff] (!%p186_p10)  ;;  %v335_v9 = vld [vmem:[%s885_s3 + $0x8] sm:$0x3] (!%p186_p10)  ;;  %vm570_vm4 = vmpackc.low (!%p186_p10), %vm342_vm2, %vm716_vm3  ;;  %s524_s5 = sshll.u32 (!%p186_p10), %s212_s30, 4  ;;  %s540_s8 = sshll.u32 (!%p186_p10), %s705_s18, 8 }
  0x11   : > { %v569_v10 = vpack.c.bf16 (!%p186_p10), %v335_v9, %v334_v8  ;;  %s214_s6 = scalar_lea.vmem (!%p186_p10), [#allocation3], %s524_s5  ;;  %s834_s11 = scalar_lea.hbm (!%p186_p10), %s886_s4, %s540_s8 }
  0x12   : > { %s836_s12 = scalar_lea.sflag (!%p186_p10), [#allocation4], %s212_s30 }
  0x13   : > { %571 = vmatprep.subr.msk.bf16.mxu1 (!%p186_p10), %vm570_vm4, %v569_v10 }
  0x14   : > { %238 = vperm.xlu0 (!%p186_p10), %634, %v230_v3   ;;  %574 = vmatpush3.bf16.msk.msra.mxu1 (!%p186_p10), %vm570_vm4, %v569_v10 }
  0x16   : > { %s218_s7 = scalar_select %p217_p11, %s705_s18, 1 }
  0x17   : > { %s717_s18 = smov [#allocation3]  }
  0x18   : > { %s539_s10 = sshll.u32 %s218_s7, 4  ;;  %s438_s7 = sshll.u32 %s214_s6, 4  ;;  %s829_s7 = int_to_ptr.vmem [resolvable:$true] %s438_s7 }
  0x19   : > { %s223_s13 = scalar_lea.vmem %s882_s0, %s539_s10  ;;  %s639_s14 = sshll.u32 %s717_s18, 4  ;;  %s640_s14 = int_to_ptr.vmem [resolvable:$false] %s639_s14 }
  0x1a   : > { %v227_v4 = vld [vmem:[%s223_s13] sm:$0xff]  ;;  %v228_v5 = vld [vmem:[%s223_s13 + $0x8] sm:$0x3]  ;;  %s635_s13 = scalar_lea.vmem %s829_s7, 256  ;;  %s641_s21 = scalar_lea.vmem %s640_s14, 512 }
  0x1b   : > { %v563_v6 = vpack.c.bf16 %v228_v5, %v227_v4  ;;  %p636_p12 = scmp.ne.s32.totalorder %s829_s7, %s635_s13  ;;  %p642_p1 = scmp.lt.s32.totalorder %s829_s7, %s640_s14 }
  0x1c   : > { %p643_p2 = scmp.lt.s32.totalorder %s641_s21, %s635_s13 }
  0x1d   : > { %565 = vmatprep.subr.msk.bf16.mxu0 %vm564_vm1, %v563_v6  ;;  %p637_p13 = pnand %p636_p12, %p785_p4 }
  0x1e   : > { %568 = vmatpush3.bf16.xpose.msk.msra.mxu0 %vm564_vm1, %v563_v6  ;;  %p644_p3 = por %p643_p2, %p642_p1 }
  0x1f   : > { %p638_p0 = pneg %p637_p13 }
  0x21   : > { %p645_p5 = pnand %p644_p3, %p638_p0 }
  0x25   : > { %554 = vmatmul.mubr.msk.f32.vlgmr.msra.gmra.mrb[0].mxu0 %vm241_vm0, %v226_v7 }
  0x8f   : > { %v234_v11 = vpop.permute.xlu0 %233 }
  0x93   : > { %v239_v12 = vpop.permute.xlu0 %238 }
  0xf8   : > { %v555_v13 = vpop.f32.mrb[0].mxu0 }
  0xf9   : > { %v326_v14 = vadd.f32 %v555_v13, %v239_v12  ;;  %v320_v15 = vpop.f32.mrb[1].mxu0 }
  0xfa   : > { %v321_v16 = vadd.f32 %v320_v15, %v234_v11 }
  0xfb   : > { %331 = vst.msk [vmem:[#allocation2 + $0x8] sm:$0xff] %vm329_vm5, %v326_v14 }
  0xfc   : > { %330 = vst.msk [vmem:[#allocation2] sm:$0xff] %vm329_vm5, %v321_v16 }
 0x102   : > { %v333_v18 = vld [vmem:[#allocation2 + $0x8] sm:$0xff] }
 0x103   : > { %v332_v17 = vld [vmem:[#allocation2] sm:$0xff] }
 0x104   : > { %560 = vmatprep.mubr.msk.f32.mxu1 %vm329_vm5, %v332_v17 }
 0x105   : > { %561 = vmatmul.mubr.msk.f32.vlgmr.msra.gmra.mrb[0].mxu1 %vm329_vm5, %v333_v18 }
 0x1d8   : > { %v562_v19 = vpop.f32.mrb[0].mxu1 }
 0x1d9   : > { %422 = vst [vmem:[%s214_s6 + $0x8] sm:$0xff] %v562_v19  ;;  %v412_v20 = vpop.f32.mrb[1].mxu1 }
 0x1da   : > { %421 = vst [vmem:[%s214_s6] sm:$0xff] %v412_v20 }
 0x1db   : > { %648 = shalt.err (!%p645_p5)
}
 0x1dc   : > { %s649_s22 = scalar_lea.hbm %s834_s11, 256  ;;  %s653_s29 = scalar_lea.hbm %s886_s4, 512 }
 0x1dd   : > { %p650_p6 = scmp.ne.s32.totalorder %s834_s11, %s649_s22  ;;  %p654_p10 = scmp.lt.u32.totalorder %s834_s11, %s886_s4 }
 0x1de   : > { %p655_p11 = scmp.lt.u32.totalorder %s653_s29, %s649_s22  ;;  %p657_p13 = scmp.lt.u32.totalorder %s649_s22, %s834_s11 }
 0x1df   : > { %p651_p7 = pnand %p650_p6, %p785_p4 }
 0x1e0   : > { %p656_p12 = por %p655_p11, %p654_p10 }
 0x1e1   : > { %p652_p9 = pneg %p651_p7 }
 0x1e2   : > { %p658_p0 = por %p657_p13, %p656_p12 }
 0x1e4   : > { %p659_p1 = pnand %p658_p0, %p652_p9 }
 0x1e6   : > { %662 = shalt.err (!%p659_p1)
}
 0x1e7   : > { %s718_s6 = smov 128   ;;  %s719_s8 = smov 8  }
 0x1e8   : > { %575 = dma.vmem_to_hbm [thread:$0]  (%p785_p4), %s829_s7, 256, %s834_s11, %s836_s12, %s718_s6, %s718_s6, %s719_s8  }
 0x1e9 PF: > { %p581_p2 = scmp.ge.s32.totalorder %s713_s20, 2  ;;  %s453_s9 = sand.u32 1, %s693_s15  }
 0x1ea   : > { %s454_s10 = scalar_lea.sflag [#allocation4], %s453_s9 }
 0x1eb   : > { %p578_p3 = pnand %p581_p2, %p792_p8 }
 0x1ed   : > { %688 = dma.done.wait (!%p578_p3), %s454_s10, 256  }
 0x1ee   : > { %690 = vsyncadd (!%p578_p3), %s454_s10, 4294967040  ;;  %s17_s20 = sadd.s32 1, %s713_s20   ;;  %s889_s15 = smov %s697_s16 }
 0x1ef   : > { %p14_p5 = scmp.ge.s32.totalorder %s17_s20, 4   ;;  %s890_s16 = smov %s701_s17 }
 0x1f0   : > { %s891_s17 = smov %s798_s28  ;;  %s892_s18 = smov %s709_s19 }
 0x1f1   : > { %s893_s19 = smov %s895_s23  ;;  %16 = sbr.rel (!%p14_p5) target bundleno = 4 (0x4), region = 71 }
 0x1f8   :  { %459 = vsyncpa [#allocation4], 1 }
 0x1f9   :  { %461 = vsyncpa [#allocation4 + $0x1], 1 }

</bundles_post_ra>
